<compile_context>
chip_gen: v7x
topology: tpu7x:2x2x1
jax: 0.10.0
libtpu: 0.0.40
codegen_flags: <defaults>
</compile_context>

<pallas_src>
import functools

import numpy as np
import jax
import jax.numpy as jnp
from jax import lax
from jax.experimental import pallas as pl
from jax.experimental.pallas import tpu as pltpu

EPS = 1e-5  # PyTorch GroupNorm default eps


def basic_block_kernel(H, W, x_ref, w1_ref, w2_ref, gb_ref, mask_ref, out_ref):
    """One batch sample per grid step.  Channels on sublanes, flattened HW on lanes.

    x_ref    : (C, HW)    f32   input sample (also the residual); batch dim squeezed
    w1_ref   : (C, 9*C)   bf16  conv1 weights, tap-major ((kh*3+kw)*C + cin)
    w2_ref   : (C, 9*C)   bf16  conv2 weights
    gb_ref   : (C, 4)     f32   packed GroupNorm affine params [g1, b1, g2, b2]
    mask_ref : (9, HW)    f32   per-tap boundary mask (channel-invariant)
    out_ref  : (C, HW)    f32   lane-dense output block
    """
    HW = H * W
    C = x_ref.shape[0]

    x = x_ref[...]      # (C, HW) f32 -- also the residual
    m = mask_ref[...]   # (9, HW) f32

    # Hoist the tap-mask broadcasts once; shared by both convs
    # (JAX does not CSE broadcast_in_dim, so don't re-broadcast inside im2col).
    bmask = [jnp.broadcast_to(m[t:t + 1, :], (C, HW)) for t in range(9)]

    def im2col_bf16(a):
        # Build the (9*C, HW) im2col operand in registers:
        #   xcol[t*C + c, p] = a[c, p + dy*W + dx]  for in-image taps, else 0.
        # jnp.roll keeps every lane defined (real, finite data), and the static per-tap
        # mask zeroes row-wrap / out-of-image positions -> exact zero padding, no
        # uninitialized memory, no partial stores, no VMEM scratch round trip.
        taps = []
        t = 0
        for dy in (-1, 0, 1):
            for dx in (-1, 0, 1):
                delta = dy * W + dx
                if delta == 0:
                    tap = a                                   # center tap: always valid
                else:
                    tap = jnp.roll(a, -delta, axis=1) * bmask[t]
                taps.append(tap)
                t += 1
        # Single wide-K (K = 9*C) slab, cast once to the MXU-native dtype.
        return jnp.concatenate(taps, axis=0).astype(jnp.bfloat16)

    def group_norm1(acc, col):
        # GroupNorm(num_groups=1): statistics over the whole (C, HW) slab.
        # Two-pass (centered) variance to avoid E[x^2]-E[x]^2 cancellation.
        n = float(acc.shape[0] * acc.shape[1])
        s = jnp.sum(acc, axis=1, keepdims=True)            # (C, 1) lane reduce
        mean = jnp.sum(s, axis=0, keepdims=True) / n       # (1, 1)
        cen = acc - mean
        s2 = jnp.sum(cen * cen, axis=1, keepdims=True)     # (C, 1)
        var = jnp.sum(s2, axis=0, keepdims=True) / n       # (1, 1)
        rstd = lax.rsqrt(var + EPS)
        g = gb_ref[:, col:col + 1]                         # (C, 1)
        b = gb_ref[:, col + 1:col + 2]                     # (C, 1)
        scale = rstd * g                                   # fold affine: 2 VPU ops/elem
        shift = b - mean * scale
        return acc * scale + shift

    # ---- conv1 (one wide-K MXU matmul, bf16 operands, f32 acc) -> GN(1) -> ReLU ----
    acc1 = jnp.dot(w1_ref[...], im2col_bf16(x), preferred_element_type=jnp.float32)
    y1 = jnp.maximum(group_norm1(acc1, 0), 0.0)

    # ---- conv2 -> GN(1) ----
    acc2 = jnp.dot(w2_ref[...], im2col_bf16(y1), preferred_element_type=jnp.float32)
    y2 = group_norm1(acc2, 2)

    # ---- residual add (stride=1, downsample=None) + ReLU; lane-dense store ----
    out_ref[...] = jnp.maximum(y2 + x, 0.0)


def basic_block_forward(x_nchw, w1, g1, b1, w2, g2, b2):
    """x_nchw: (N, C, H, W); w*: (Cout, Cin, 3, 3) torch OIHW; g*/b*: (Cout,)."""
    N, Cin, H, W = x_nchw.shape
    Cout = w1.shape[0]
    assert Cin == Cout, "stride=1, downsample=None path requires inplanes == planes"
    C, HW = Cout, H * W

    # NCHW already has channels leading: flatten spatial onto the lane axis.
    x_flat = x_nchw.reshape(N, C, HW).astype(jnp.float32)

    def flat_w(w):
        # (O, I, 3, 3) -> (O, 9*I) with flat index (kh*3 + kw)*I + cin; bf16 for the MXU.
        o, i = w.shape[0], w.shape[1]
        return jnp.transpose(w, (0, 2, 3, 1)).reshape(o, 9 * i).astype(jnp.bfloat16)

    w1_k, w2_k = flat_w(w1), flat_w(w2)

    # Pack the 4 GroupNorm affine vectors into one (C, 4) input: columns [g1, b1, g2, b2].
    gb = jnp.stack([g1, b1, g2, b2], axis=1).astype(jnp.float32)

    # Static per-tap validity masks over flattened output positions p = h*W + w.
    # Channel-invariant -> shape (9, HW); broadcast over C inside the kernel.
    # Kept f32 so the mask math stays native on v5e (no bf16 VPU there).
    rr, cc = np.arange(HW) // W, np.arange(HW) % W
    mask = np.zeros((9, HW), np.float32)
    t = 0
    for dy in (-1, 0, 1):
        for dx in (-1, 0, 1):
            valid = (rr + dy >= 0) & (rr + dy < H) & (cc + dx >= 0) & (cc + dx < W)
            mask[t] = valid.astype(np.float32)
            t += 1
    mask = jnp.asarray(mask)

    kernel = functools.partial(basic_block_kernel, H, W)

    out_flat = pl.pallas_call(
        kernel,
        out_shape=jax.ShapeDtypeStruct((N, C, HW), jnp.float32),
        grid=(N,),
        in_specs=[
            pl.BlockSpec((None, C, HW), lambda n: (n, 0, 0)),   # x (batch dim squeezed)
            pl.BlockSpec((C, 9 * C), lambda n: (0, 0)),         # w1
            pl.BlockSpec((C, 9 * C), lambda n: (0, 0)),         # w2
            pl.BlockSpec((C, 4), lambda n: (0, 0)),             # packed g/b
            pl.BlockSpec((9, HW), lambda n: (0, 0)),            # tap mask
        ],
        out_specs=pl.BlockSpec((None, C, HW), lambda n: (n, 0, 0)),
        compiler_params=pltpu.CompilerParams(
            dimension_semantics=("parallel",)),  # batch shards across the 2 TCs on v7x
    )(x_flat, w1_k, w2_k, gb, mask)

    return out_flat.reshape(N, C, H, W)  # (N, C, HW) is already NCHW order


def basic_block_reference(x, w1, g1, b1, w2, g2, b2):
    """Pure-JAX NCHW reference mirroring the PyTorch forward (full f32 precision)."""
    def conv(inp, w):
        return lax.conv_general_dilated(
            inp, w, window_strides=(1, 1), padding=((1, 1), (1, 1)),
            dimension_numbers=("NCHW", "OIHW", "NCHW"),
            precision=lax.Precision.HIGHEST)

    def gn(inp, g, b):
        mean = jnp.mean(inp, axis=(1, 2, 3), keepdims=True)
        var = jnp.mean((inp - mean) ** 2, axis=(1, 2, 3), keepdims=True)
        y = (inp - mean) / jnp.sqrt(var + EPS)
        return y * g[None, :, None, None] + b[None, :, None, None]

    out = conv(x, w1)
    out = jnp.maximum(gn(out, g1, b1), 0.0)
    out = conv(out, w2)
    out = gn(out, g2, b2)
    return jnp.maximum(out + x, 0.0)


if __name__ == "__main__":
    N, C, H, W = 2, 4, 16, 16  # inplanes = planes = 4, stride = 1, downsample = None

    key = jax.random.PRNGKey(0)
    kx, kw1, kw2, kg1, kb1, kg2, kb2 = jax.random.split(key, 7)

    x = jax.random.normal(kx, (N, C, H, W), jnp.float32)
    w1 = 0.2 * jax.random.normal(kw1, (C, C, 3, 3), jnp.float32)
    w2 = 0.2 * jax.random.normal(kw2, (C, C, 3, 3), jnp.float32)
    g1 = 1.0 + 0.1 * jax.random.normal(kg1, (C,), jnp.float32)
    b1 = 0.1 * jax.random.normal(kb1, (C,), jnp.float32)
    g2 = 1.0 + 0.1 * jax.random.normal(kg2, (C,), jnp.float32)
    b2 = 0.1 * jax.random.normal(kb2, (C,), jnp.float32)

    out = jax.block_until_ready(basic_block_forward(x, w1, g1, b1, w2, g2, b2))
    ref = jax.block_until_ready(basic_block_reference(x, w1, g1, b1, w2, g2, b2))

    assert out.shape == (N, C, H, W)
    # The kernel feeds the MXU bf16 operands (per the perf review) while the reference is
    # f32 HIGHEST; the estimated worst-case error through two convs + two GroupNorms is
    # ~2e-2, so compare with a bf16-appropriate tolerance.
    err = float(jnp.max(jnp.abs(out - ref)))
    assert jnp.allclose(out, ref, atol=5e-2, rtol=5e-2), f"mismatch vs reference, max|err|={err}"

    print("KERNEL_OK")
</pallas_src>

<mosaic_0001>
module attributes {stable_mosaic.version = 11 : i64} {
  func.func @basic_block_kernel(%arg0: i32, %arg1: memref<1x4x256xf32, #tpu.memory_space<vmem>>, %arg2: memref<4x36xbf16, #tpu.memory_space<vmem>>, %arg3: memref<4x36xbf16, #tpu.memory_space<vmem>>, %arg4: memref<4x4xf32, #tpu.memory_space<vmem>>, %arg5: memref<9x256xf32, #tpu.memory_space<vmem>>, %arg6: memref<1x4x256xf32, #tpu.memory_space<vmem>>) attributes {dimension_semantics = [#tpu.dimension_semantics<parallel>], iteration_bounds = array<i64: 2>, scalar_prefetch = 0 : i64, scratch_operands = 0 : i64, tpu.core_type = #tpu.core_type<tc>, window_params = [{transform_indices = @transform_0, window_bounds = array<i64: 1, 4, 256>}, {pipeline_mode = #tpu.pipeline_mode<synchronous>, transform_indices = @transform_1, window_bounds = array<i64: 4, 36>}, {pipeline_mode = #tpu.pipeline_mode<synchronous>, transform_indices = @transform_2, window_bounds = array<i64: 4, 36>}, {pipeline_mode = #tpu.pipeline_mode<synchronous>, transform_indices = @transform_3, window_bounds = array<i64: 4, 4>}, {pipeline_mode = #tpu.pipeline_mode<synchronous>, transform_indices = @transform_4, window_bounds = array<i64: 9, 256>}, {transform_indices = @transform_5, window_bounds = array<i64: 1, 4, 256>}]} {
    %c0 = arith.constant 0 : index
    %c0_0 = arith.constant 0 : index
    %c0_1 = arith.constant 0 : index
    %0 = vector.load %arg1[%c0, %c0_0, %c0_1] : memref<1x4x256xf32, #tpu.memory_space<vmem>>, vector<1x4x256xf32>
    %1 = vector.shape_cast %0 : vector<1x4x256xf32> to vector<4x256xf32>
    %c0_2 = arith.constant 0 : index
    %c0_3 = arith.constant 0 : index
    %2 = vector.load %arg5[%c0_2, %c0_3] : memref<9x256xf32, #tpu.memory_space<vmem>>, vector<9x256xf32>
    %3 = vector.extract_strided_slice %2 {offsets = [0, 0], sizes = [1, 256], strides = [1, 1]} : vector<9x256xf32> to vector<1x256xf32>
    %4 = vector.shape_cast %3 : vector<1x256xf32> to vector<1x256xf32>
    %5 = vector.broadcast %4 : vector<1x256xf32> to vector<4x256xf32>
    %6 = vector.extract_strided_slice %2 {offsets = [1, 0], sizes = [1, 256], strides = [1, 1]} : vector<9x256xf32> to vector<1x256xf32>
    %7 = vector.shape_cast %6 : vector<1x256xf32> to vector<1x256xf32>
    %8 = vector.broadcast %7 : vector<1x256xf32> to vector<4x256xf32>
    %9 = vector.extract_strided_slice %2 {offsets = [2, 0], sizes = [1, 256], strides = [1, 1]} : vector<9x256xf32> to vector<1x256xf32>
    %10 = vector.shape_cast %9 : vector<1x256xf32> to vector<1x256xf32>
    %11 = vector.broadcast %10 : vector<1x256xf32> to vector<4x256xf32>
    %12 = vector.extract_strided_slice %2 {offsets = [3, 0], sizes = [1, 256], strides = [1, 1]} : vector<9x256xf32> to vector<1x256xf32>
    %13 = vector.shape_cast %12 : vector<1x256xf32> to vector<1x256xf32>
    %14 = vector.broadcast %13 : vector<1x256xf32> to vector<4x256xf32>
    %15 = vector.extract_strided_slice %2 {offsets = [5, 0], sizes = [1, 256], strides = [1, 1]} : vector<9x256xf32> to vector<1x256xf32>
    %16 = vector.shape_cast %15 : vector<1x256xf32> to vector<1x256xf32>
    %17 = vector.broadcast %16 : vector<1x256xf32> to vector<4x256xf32>
    %18 = vector.extract_strided_slice %2 {offsets = [6, 0], sizes = [1, 256], strides = [1, 1]} : vector<9x256xf32> to vector<1x256xf32>
    %19 = vector.shape_cast %18 : vector<1x256xf32> to vector<1x256xf32>
    %20 = vector.broadcast %19 : vector<1x256xf32> to vector<4x256xf32>
    %21 = vector.extract_strided_slice %2 {offsets = [7, 0], sizes = [1, 256], strides = [1, 1]} : vector<9x256xf32> to vector<1x256xf32>
    %22 = vector.shape_cast %21 : vector<1x256xf32> to vector<1x256xf32>
    %23 = vector.broadcast %22 : vector<1x256xf32> to vector<4x256xf32>
    %24 = vector.extract_strided_slice %2 {offsets = [8, 0], sizes = [1, 256], strides = [1, 1]} : vector<9x256xf32> to vector<1x256xf32>
    %25 = vector.shape_cast %24 : vector<1x256xf32> to vector<1x256xf32>
    %26 = vector.broadcast %25 : vector<1x256xf32> to vector<4x256xf32>
    %c0_4 = arith.constant 0 : index
    %c0_5 = arith.constant 0 : index
    %27 = vector.load %arg2[%c0_4, %c0_5] : memref<4x36xbf16, #tpu.memory_space<vmem>>, vector<4x36xbf16>
    %28 = vector.extract_strided_slice %1 {offsets = [0, 239], sizes = [4, 17], strides = [1, 1]} : vector<4x256xf32> to vector<4x17xf32>
    %29 = vector.extract_strided_slice %1 {offsets = [0, 0], sizes = [4, 239], strides = [1, 1]} : vector<4x256xf32> to vector<4x239xf32>
    %30 = tpu.concatenate %28, %29 in 1 : vector<4x17xf32>, vector<4x239xf32> -> vector<4x256xf32>
    %31 = arith.mulf %30, %5 : vector<4x256xf32>
    %32 = vector.extract_strided_slice %1 {offsets = [0, 240], sizes = [4, 16], strides = [1, 1]} : vector<4x256xf32> to vector<4x16xf32>
    %33 = vector.extract_strided_slice %1 {offsets = [0, 0], sizes = [4, 240], strides = [1, 1]} : vector<4x256xf32> to vector<4x240xf32>
    %34 = tpu.concatenate %32, %33 in 1 : vector<4x16xf32>, vector<4x240xf32> -> vector<4x256xf32>
    %35 = arith.mulf %34, %8 : vector<4x256xf32>
    %36 = vector.extract_strided_slice %1 {offsets = [0, 241], sizes = [4, 15], strides = [1, 1]} : vector<4x256xf32> to vector<4x15xf32>
    %37 = vector.extract_strided_slice %1 {offsets = [0, 0], sizes = [4, 241], strides = [1, 1]} : vector<4x256xf32> to vector<4x241xf32>
    %38 = tpu.concatenate %36, %37 in 1 : vector<4x15xf32>, vector<4x241xf32> -> vector<4x256xf32>
    %39 = arith.mulf %38, %11 : vector<4x256xf32>
    %40 = vector.extract_strided_slice %1 {offsets = [0, 255], sizes = [4, 1], strides = [1, 1]} : vector<4x256xf32> to vector<4x1xf32>
    %41 = vector.extract_strided_slice %1 {offsets = [0, 0], sizes = [4, 255], strides = [1, 1]} : vector<4x256xf32> to vector<4x255xf32>
    %42 = tpu.concatenate %40, %41 in 1 : vector<4x1xf32>, vector<4x255xf32> -> vector<4x256xf32>
    %43 = arith.mulf %42, %14 : vector<4x256xf32>
    %44 = vector.extract_strided_slice %1 {offsets = [0, 1], sizes = [4, 255], strides = [1, 1]} : vector<4x256xf32> to vector<4x255xf32>
    %45 = vector.extract_strided_slice %1 {offsets = [0, 0], sizes = [4, 1], strides = [1, 1]} : vector<4x256xf32> to vector<4x1xf32>
    %46 = tpu.concatenate %44, %45 in 1 : vector<4x255xf32>, vector<4x1xf32> -> vector<4x256xf32>
    %47 = arith.mulf %46, %17 : vector<4x256xf32>
    %48 = vector.extract_strided_slice %1 {offsets = [0, 15], sizes = [4, 241], strides = [1, 1]} : vector<4x256xf32> to vector<4x241xf32>
    %49 = vector.extract_strided_slice %1 {offsets = [0, 0], sizes = [4, 15], strides = [1, 1]} : vector<4x256xf32> to vector<4x15xf32>
    %50 = tpu.concatenate %48, %49 in 1 : vector<4x241xf32>, vector<4x15xf32> -> vector<4x256xf32>
    %51 = arith.mulf %50, %20 : vector<4x256xf32>
    %52 = vector.extract_strided_slice %1 {offsets = [0, 16], sizes = [4, 240], strides = [1, 1]} : vector<4x256xf32> to vector<4x240xf32>
    %53 = vector.extract_strided_slice %1 {offsets = [0, 0], sizes = [4, 16], strides = [1, 1]} : vector<4x256xf32> to vector<4x16xf32>
    %54 = tpu.concatenate %52, %53 in 1 : vector<4x240xf32>, vector<4x16xf32> -> vector<4x256xf32>
    %55 = arith.mulf %54, %23 : vector<4x256xf32>
    %56 = vector.extract_strided_slice %1 {offsets = [0, 17], sizes = [4, 239], strides = [1, 1]} : vector<4x256xf32> to vector<4x239xf32>
    %57 = vector.extract_strided_slice %1 {offsets = [0, 0], sizes = [4, 17], strides = [1, 1]} : vector<4x256xf32> to vector<4x17xf32>
    %58 = tpu.concatenate %56, %57 in 1 : vector<4x239xf32>, vector<4x17xf32> -> vector<4x256xf32>
    %59 = arith.mulf %58, %26 : vector<4x256xf32>
    %60 = tpu.concatenate %31, %35, %39, %43, %1, %47, %51, %55, %59 in 0 : vector<4x256xf32>, vector<4x256xf32>, vector<4x256xf32>, vector<4x256xf32>, vector<4x256xf32>, vector<4x256xf32>, vector<4x256xf32>, vector<4x256xf32>, vector<4x256xf32> -> vector<36x256xf32>
    %61 = arith.truncf %60 : vector<36x256xf32> to vector<36x256xbf16>
    %cst = arith.constant dense<0.000000e+00> : vector<4x256xf32>
    %62 = tpu.matmul %27, %61, %cst {dimension_numbers = #tpu.dot_dimension_numbers<[1], [0], [0], [1], [0, 0, 1, 1], [], []>} : vector<4x36xbf16>, vector<36x256xbf16>, vector<4x256xf32> -> vector<4x256xf32>
    %cst_6 = arith.constant dense<0.000000e+00> : vector<4xf32>
    %63 = vector.multi_reduction <add>, %62, %cst_6 [1] : vector<4x256xf32> to vector<4xf32>
    %64 = vector.shape_cast %63 : vector<4xf32> to vector<4x1xf32>
    %cst_7 = arith.constant dense<0.000000e+00> : vector<1xf32>
    %65 = vector.multi_reduction <add>, %64, %cst_7 [0] : vector<4x1xf32> to vector<1xf32>
    %66 = vector.shape_cast %65 : vector<1xf32> to vector<1x1xf32>
    %cst_8 = arith.constant 1.024000e+03 : f32
    %67 = vector.broadcast %cst_8 : f32 to vector<1x1xf32>
    %68 = arith.divf %66, %67 : vector<1x1xf32>
    %69 = vector.broadcast %68 : vector<1x1xf32> to vector<4x256xf32>
    %70 = arith.subf %62, %69 : vector<4x256xf32>
    %71 = arith.mulf %70, %70 : vector<4x256xf32>
    %cst_9 = arith.constant dense<0.000000e+00> : vector<4xf32>
    %72 = vector.multi_reduction <add>, %71, %cst_9 [1] : vector<4x256xf32> to vector<4xf32>
    %73 = vector.shape_cast %72 : vector<4xf32> to vector<4x1xf32>
    %cst_10 = arith.constant dense<0.000000e+00> : vector<1xf32>
    %74 = vector.multi_reduction <add>, %73, %cst_10 [0] : vector<4x1xf32> to vector<1xf32>
    %75 = vector.shape_cast %74 : vector<1xf32> to vector<1x1xf32>
    %cst_11 = arith.constant 1.024000e+03 : f32
    %76 = vector.broadcast %cst_11 : f32 to vector<1x1xf32>
    %77 = arith.divf %75, %76 : vector<1x1xf32>
    %cst_12 = arith.constant 9.99999974E-6 : f32
    %78 = vector.broadcast %cst_12 : f32 to vector<1x1xf32>
    %79 = arith.addf %77, %78 : vector<1x1xf32>
    %80 = math.rsqrt %79 : vector<1x1xf32>
    %c0_13 = arith.constant 0 : index
    %c0_14 = arith.constant 0 : index
    %81 = vector.load %arg4[%c0_13, %c0_14] : memref<4x4xf32, #tpu.memory_space<vmem>>, vector<4x1xf32>
    %c0_15 = arith.constant 0 : index
    %c1 = arith.constant 1 : index
    %82 = vector.load %arg4[%c0_15, %c1] : memref<4x4xf32, #tpu.memory_space<vmem>>, vector<4x1xf32>
    %83 = vector.broadcast %80 : vector<1x1xf32> to vector<4x1xf32>
    %84 = arith.mulf %83, %81 : vector<4x1xf32>
    %85 = vector.broadcast %68 : vector<1x1xf32> to vector<4x1xf32>
    %86 = arith.mulf %85, %84 : vector<4x1xf32>
    %87 = arith.subf %82, %86 : vector<4x1xf32>
    %88 = vector.broadcast %84 : vector<4x1xf32> to vector<4x256xf32>
    %89 = arith.mulf %62, %88 : vector<4x256xf32>
    %90 = vector.broadcast %87 : vector<4x1xf32> to vector<4x256xf32>
    %91 = arith.addf %89, %90 : vector<4x256xf32>
    %cst_16 = arith.constant 0.000000e+00 : f32
    %92 = vector.broadcast %cst_16 : f32 to vector<4x256xf32>
    %93 = arith.maximumf %91, %92 : vector<4x256xf32>
    %c0_17 = arith.constant 0 : index
    %c0_18 = arith.constant 0 : index
    %94 = vector.load %arg3[%c0_17, %c0_18] : memref<4x36xbf16, #tpu.memory_space<vmem>>, vector<4x36xbf16>
    %95 = vector.extract_strided_slice %93 {offsets = [0, 239], sizes = [4, 17], strides = [1, 1]} : vector<4x256xf32> to vector<4x17xf32>
    %96 = vector.extract_strided_slice %93 {offsets = [0, 0], sizes = [4, 239], strides = [1, 1]} : vector<4x256xf32> to vector<4x239xf32>
    %97 = tpu.concatenate %95, %96 in 1 : vector<4x17xf32>, vector<4x239xf32> -> vector<4x256xf32>
    %98 = arith.mulf %97, %5 : vector<4x256xf32>
    %99 = vector.extract_strided_slice %93 {offsets = [0, 240], sizes = [4, 16], strides = [1, 1]} : vector<4x256xf32> to vector<4x16xf32>
    %100 = vector.extract_strided_slice %93 {offsets = [0, 0], sizes = [4, 240], strides = [1, 1]} : vector<4x256xf32> to vector<4x240xf32>
    %101 = tpu.concatenate %99, %100 in 1 : vector<4x16xf32>, vector<4x240xf32> -> vector<4x256xf32>
    %102 = arith.mulf %101, %8 : vector<4x256xf32>
    %103 = vector.extract_strided_slice %93 {offsets = [0, 241], sizes = [4, 15], strides = [1, 1]} : vector<4x256xf32> to vector<4x15xf32>
    %104 = vector.extract_strided_slice %93 {offsets = [0, 0], sizes = [4, 241], strides = [1, 1]} : vector<4x256xf32> to vector<4x241xf32>
    %105 = tpu.concatenate %103, %104 in 1 : vector<4x15xf32>, vector<4x241xf32> -> vector<4x256xf32>
    %106 = arith.mulf %105, %11 : vector<4x256xf32>
    %107 = vector.extract_strided_slice %93 {offsets = [0, 255], sizes = [4, 1], strides = [1, 1]} : vector<4x256xf32> to vector<4x1xf32>
    %108 = vector.extract_strided_slice %93 {offsets = [0, 0], sizes = [4, 255], strides = [1, 1]} : vector<4x256xf32> to vector<4x255xf32>
    %109 = tpu.concatenate %107, %108 in 1 : vector<4x1xf32>, vector<4x255xf32> -> vector<4x256xf32>
    %110 = arith.mulf %109, %14 : vector<4x256xf32>
    %111 = vector.extract_strided_slice %93 {offsets = [0, 1], sizes = [4, 255], strides = [1, 1]} : vector<4x256xf32> to vector<4x255xf32>
    %112 = vector.extract_strided_slice %93 {offsets = [0, 0], sizes = [4, 1], strides = [1, 1]} : vector<4x256xf32> to vector<4x1xf32>
    %113 = tpu.concatenate %111, %112 in 1 : vector<4x255xf32>, vector<4x1xf32> -> vector<4x256xf32>
    %114 = arith.mulf %113, %17 : vector<4x256xf32>
    %115 = vector.extract_strided_slice %93 {offsets = [0, 15], sizes = [4, 241], strides = [1, 1]} : vector<4x256xf32> to vector<4x241xf32>
    %116 = vector.extract_strided_slice %93 {offsets = [0, 0], sizes = [4, 15], strides = [1, 1]} : vector<4x256xf32> to vector<4x15xf32>
    %117 = tpu.concatenate %115, %116 in 1 : vector<4x241xf32>, vector<4x15xf32> -> vector<4x256xf32>
    %118 = arith.mulf %117, %20 : vector<4x256xf32>
    %119 = vector.extract_strided_slice %93 {offsets = [0, 16], sizes = [4, 240], strides = [1, 1]} : vector<4x256xf32> to vector<4x240xf32>
    %120 = vector.extract_strided_slice %93 {offsets = [0, 0], sizes = [4, 16], strides = [1, 1]} : vector<4x256xf32> to vector<4x16xf32>
    %121 = tpu.concatenate %119, %120 in 1 : vector<4x240xf32>, vector<4x16xf32> -> vector<4x256xf32>
    %122 = arith.mulf %121, %23 : vector<4x256xf32>
    %123 = vector.extract_strided_slice %93 {offsets = [0, 17], sizes = [4, 239], strides = [1, 1]} : vector<4x256xf32> to vector<4x239xf32>
    %124 = vector.extract_strided_slice %93 {offsets = [0, 0], sizes = [4, 17], strides = [1, 1]} : vector<4x256xf32> to vector<4x17xf32>
    %125 = tpu.concatenate %123, %124 in 1 : vector<4x239xf32>, vector<4x17xf32> -> vector<4x256xf32>
    %126 = arith.mulf %125, %26 : vector<4x256xf32>
    %127 = tpu.concatenate %98, %102, %106, %110, %93, %114, %118, %122, %126 in 0 : vector<4x256xf32>, vector<4x256xf32>, vector<4x256xf32>, vector<4x256xf32>, vector<4x256xf32>, vector<4x256xf32>, vector<4x256xf32>, vector<4x256xf32>, vector<4x256xf32> -> vector<36x256xf32>
    %128 = arith.truncf %127 : vector<36x256xf32> to vector<36x256xbf16>
    %cst_19 = arith.constant dense<0.000000e+00> : vector<4x256xf32>
    %129 = tpu.matmul %94, %128, %cst_19 {dimension_numbers = #tpu.dot_dimension_numbers<[1], [0], [0], [1], [0, 0, 1, 1], [], []>} : vector<4x36xbf16>, vector<36x256xbf16>, vector<4x256xf32> -> vector<4x256xf32>
    %cst_20 = arith.constant dense<0.000000e+00> : vector<4xf32>
    %130 = vector.multi_reduction <add>, %129, %cst_20 [1] : vector<4x256xf32> to vector<4xf32>
    %131 = vector.shape_cast %130 : vector<4xf32> to vector<4x1xf32>
    %cst_21 = arith.constant dense<0.000000e+00> : vector<1xf32>
    %132 = vector.multi_reduction <add>, %131, %cst_21 [0] : vector<4x1xf32> to vector<1xf32>
    %133 = vector.shape_cast %132 : vector<1xf32> to vector<1x1xf32>
    %cst_22 = arith.constant 1.024000e+03 : f32
    %134 = vector.broadcast %cst_22 : f32 to vector<1x1xf32>
    %135 = arith.divf %133, %134 : vector<1x1xf32>
    %136 = vector.broadcast %135 : vector<1x1xf32> to vector<4x256xf32>
    %137 = arith.subf %129, %136 : vector<4x256xf32>
    %138 = arith.mulf %137, %137 : vector<4x256xf32>
    %cst_23 = arith.constant dense<0.000000e+00> : vector<4xf32>
    %139 = vector.multi_reduction <add>, %138, %cst_23 [1] : vector<4x256xf32> to vector<4xf32>
    %140 = vector.shape_cast %139 : vector<4xf32> to vector<4x1xf32>
    %cst_24 = arith.constant dense<0.000000e+00> : vector<1xf32>
    %141 = vector.multi_reduction <add>, %140, %cst_24 [0] : vector<4x1xf32> to vector<1xf32>
    %142 = vector.shape_cast %141 : vector<1xf32> to vector<1x1xf32>
    %cst_25 = arith.constant 1.024000e+03 : f32
    %143 = vector.broadcast %cst_25 : f32 to vector<1x1xf32>
    %144 = arith.divf %142, %143 : vector<1x1xf32>
    %cst_26 = arith.constant 9.99999974E-6 : f32
    %145 = vector.broadcast %cst_26 : f32 to vector<1x1xf32>
    %146 = arith.addf %144, %145 : vector<1x1xf32>
    %147 = math.rsqrt %146 : vector<1x1xf32>
    %c0_27 = arith.constant 0 : index
    %c2 = arith.constant 2 : index
    %148 = vector.load %arg4[%c0_27, %c2] : memref<4x4xf32, #tpu.memory_space<vmem>>, vector<4x1xf32>
    %c0_28 = arith.constant 0 : index
    %c3 = arith.constant 3 : index
    %149 = vector.load %arg4[%c0_28, %c3] : memref<4x4xf32, #tpu.memory_space<vmem>>, vector<4x1xf32>
    %150 = vector.broadcast %147 : vector<1x1xf32> to vector<4x1xf32>
    %151 = arith.mulf %150, %148 : vector<4x1xf32>
    %152 = vector.broadcast %135 : vector<1x1xf32> to vector<4x1xf32>
    %153 = arith.mulf %152, %151 : vector<4x1xf32>
    %154 = arith.subf %149, %153 : vector<4x1xf32>
    %155 = vector.broadcast %151 : vector<4x1xf32> to vector<4x256xf32>
    %156 = arith.mulf %129, %155 : vector<4x256xf32>
    %157 = vector.broadcast %154 : vector<4x1xf32> to vector<4x256xf32>
    %158 = arith.addf %156, %157 : vector<4x256xf32>
    %159 = arith.addf %158, %1 : vector<4x256xf32>
    %cst_29 = arith.constant 0.000000e+00 : f32
    %160 = vector.broadcast %cst_29 : f32 to vector<4x256xf32>
    %161 = arith.maximumf %159, %160 : vector<4x256xf32>
    %c0_30 = arith.constant 0 : index
    %c0_31 = arith.constant 0 : index
    %c0_32 = arith.constant 0 : index
    %162 = vector.load %arg6[%c0_30, %c0_31, %c0_32] : memref<1x4x256xf32, #tpu.memory_space<vmem>>, vector<1x4x256xf32>
    %163 = vector.shape_cast %162 : vector<1x4x256xf32> to vector<4x256xf32>
    %164 = vector.shape_cast %161 : vector<4x256xf32> to vector<1x4x256xf32>
    tpu.vector_store %arg6[%c0_30, %c0_31, %c0_32], %164 {strides = array<i32>} : memref<1x4x256xf32, #tpu.memory_space<vmem>>, vector<1x4x256xf32>,
    return
  }
  func.func @transform_0(%arg0: i32) -> (i32, i32, i32) {
    %c0_i32 = arith.constant 0 : i32
    %c0_i32_0 = arith.constant 0 : i32
    %c0_i32_1 = arith.constant 0 : i32
    return %arg0, %c0_i32, %c0_i32_0 : i32, i32, i32
  }
  func.func @transform_1(%arg0: i32) -> (i32, i32) {
    %c0_i32 = arith.constant 0 : i32
    %c0_i32_0 = arith.constant 0 : i32
    %c0_i32_1 = arith.constant 0 : i32
    return %c0_i32, %c0_i32_0 : i32, i32
  }
  func.func @transform_2(%arg0: i32) -> (i32, i32) {
    %c0_i32 = arith.constant 0 : i32
    %c0_i32_0 = arith.constant 0 : i32
    %c0_i32_1 = arith.constant 0 : i32
    return %c0_i32, %c0_i32_0 : i32, i32
  }
  func.func @transform_3(%arg0: i32) -> (i32, i32) {
    %c0_i32 = arith.constant 0 : i32
    %c0_i32_0 = arith.constant 0 : i32
    %c0_i32_1 = arith.constant 0 : i32
    return %c0_i32, %c0_i32_0 : i32, i32
  }
  func.func @transform_4(%arg0: i32) -> (i32, i32) {
    %c0_i32 = arith.constant 0 : i32
    %c0_i32_0 = arith.constant 0 : i32
    %c0_i32_1 = arith.constant 0 : i32
    return %c0_i32, %c0_i32_0 : i32, i32
  }
  func.func @transform_5(%arg0: i32) -> (i32, i32, i32) {
    %c0_i32 = arith.constant 0 : i32
    %c0_i32_0 = arith.constant 0 : i32
    %c0_i32_1 = arith.constant 0 : i32
    return %arg0, %c0_i32, %c0_i32_0 : i32, i32, i32
  }
}

</mosaic_0001>

<bundles_post_ra>
// kernel: tpu_custom_call.1
= control target key start
LH: loop header
LB: loop body
LE: loop exit
PB: predicated region body
PF: predicated region fallthrough
CT: control target
= control target key end

     0   :  { %10 = vsyncpa [#allocation3], 0  ;;  %s1730_s0 = inlined_call_operand.hbm [shape: f32[2,4,256], index: 0, kind: input, shape index: {}]   ;;  %s1731_s1 = inlined_call_operand.vmem [shape: bf16[4,36], index: 1, kind: input, shape index: {}]   ;;  %s1732_s2 = inlined_call_operand.hbm [shape: bf16[4,36], index: 2, kind: input, shape index: {}]   ;;  %s1733_s3 = inlined_call_operand.vmem [shape: f32[4,4], index: 3, kind: input, shape index: {}]   ;;  %s1734_s4 = inlined_call_operand.hbm [shape: f32[9,256], index: 4, kind: input, shape index: {}]   ;;  %s1735_s5 = inlined_call_operand.hbm [shape: f32[2,4,256], index: 5, kind: output, shape index: {}]  }
   0x1   :  { %12 = vsyncpa [#allocation3 + $0x1], 0 }
   0x2   :  { %13 = vsyncpa [#allocation6], 0 }
   0x3   :  { %14 = vsyncpa [#allocation4], 0 }
   0x4   :  { %16 = vsyncpa [#allocation4 + $0x1], 0  ;;  %s1253_s18 = smov 0   ;;  %s1255_s19 = smov 0  }
   0x5   :  { %s1257_s20 = smov 0   ;;  %s1259_s21 = smov 0  }
   0x6 LB: > { %s1274_s22 = sadd.s32 4294967295, %s1203_s21   ;;  %s931_s23 = sadd.s32 4294967294, %s1203_s21   ;;  %s1203_s21 = sphi %s1259_s21, %s1755_s21   ;;  %s1199_s20 = sphi %s1257_s20, %s1754_s20   ;;  %s1195_s19 = sphi %s1255_s19, %s1753_s19   ;;  %s1191_s18 = sphi %s1253_s18, %s1752_s18  }
   0x7   : > { %p42_p0 = scmp.ne.s32.totalorder %s1195_s19, %s1191_s18  ;;  %p1736_p1 = scmp.eq.s32.totalorder %s1274_s22, 0 }
   0x8   : > { %p156_p3 = scmp.eq.s32.totalorder %s931_s23, 1  ;;  %p932_p5 = scmp.ge.s32.totalorder %s1203_s21, 1 }
   0x9   : > { %p1283_p4 = por %p1736_p1, %p42_p0  ;;  %p163_p7 = scmp.lt.s32.totalorder %s1203_s21, 3 }
   0xa   : > { %p1288_p6 = por %p156_p3, %p42_p0  ;;  %s1205_s27 = smov [#allocation5]  }
   0xb   : > { %s1739_s24 = scalar_select %p1283_p4, 1, 0 }
   0xc   : > { %s1740_s25 = scalar_select %p1288_p6, 1, 0 }
   0xd   : > { %p1293_p8 = pnand %p932_p5, %p163_p7  ;;  %s179_s28 = sshll.u32 %s1205_s27, 4  ;;  %s180_s28 = int_to_ptr.vmem [resolvable:$true] %s179_s28 }
   0xe   : > { %s1206_s29 = smov [#allocation7]   ;;  %s1047_s9 = scalar_lea.hbm %s1732_s2, 32 }
   0xf   : > { %s1741_s26 = scalar_select %p1293_p8, 1, 0 }
  0x10   : > { %p969_p10 = pneg %p1293_p8  ;;  %s192_s30 = sshll.u32 %s1206_s29, 4  ;;  %s1306_s30 = int_to_ptr.vmem [resolvable:$true] %s192_s30 }
  0x11   : > { %p1048_p12 = scmp.ne.s32.totalorder %s1732_s2, %s1047_s9  ;;  %p1054_p5 = scmp.lt.u32.totalorder %s1047_s9, %s1732_s2 }
  0x12   : > { %p1302_p11 = pnand %p969_p10, %p1736_p1 }
  0x14   : > { %p1049_p13 = pneg %p1302_p11 }
  0x16   : > { %p1050_p0 = pnand %p1049_p13, %p1048_p12 }
  0x18   : > { %p1051_p3 = pneg %p1050_p0 }
  0x1a   : > { %p1056_p7 = pnand %p1054_p5, %p1051_p3 }
  0x1c   : > { %1059 = shalt.err (!%p1056_p7)
}
  0x1d   : > { %s1060_s14 = scalar_lea.vmem %s180_s28, 32  ;;  %p1068_p2 = scmp.lt.s32.totalorder %s180_s28, %s180_s28 }
  0x1e   : > { %p1061_p10 = scmp.ne.s32.totalorder %s180_s28, %s1060_s14  ;;  %p1069_p6 = scmp.lt.s32.totalorder %s1060_s14, %s1060_s14 }
  0x20   : > { %p1063_p9 = pnand %p1061_p10, %p1049_p13  ;;  %p1070_p4 = por %p1069_p6, %p1068_p2 }
  0x22   : > { %p1064_p1 = pneg %p1063_p9 }
  0x24   : > { %p1071_p8 = pnand %p1070_p4, %p1064_p1 }
  0x26   : > { %1074 = shalt.err (!%p1071_p8)
}
  0x27   : > { %972 = dma.hbm_to_vmem [thread:$0]  (!%p1302_p11), %s1732_s2, 32, %s180_s28, [#allocation6]  }
  0x28   : > { %s1075_s27 = scalar_lea.hbm %s1734_s4, 512 }
  0x29   : > { %p1076_p9 = scmp.ne.s32.totalorder %s1734_s4, %s1075_s27  ;;  %p1082_p4 = scmp.lt.u32.totalorder %s1075_s27, %s1734_s4 }
  0x2b   : > { %p1078_p2 = pnand %p1076_p9, %p1049_p13 }
  0x2d   : > { %p1079_p1 = pneg %p1078_p2 }
  0x2f   : > { %p1084_p6 = pnand %p1082_p4, %p1079_p1 }
  0x31   : > { %1087 = shalt.err (!%p1084_p6)
}
  0x32   : > { %s1088_s28 = scalar_lea.vmem %s1306_s30, 512  ;;  %p1096_p3 = scmp.lt.s32.totalorder %s1306_s30, %s1306_s30 }
  0x33   : > { %p1089_p8 = scmp.ne.s32.totalorder %s1306_s30, %s1088_s28  ;;  %p1097_p5 = scmp.lt.s32.totalorder %s1088_s28, %s1088_s28 }
  0x35   : > { %p1091_p12 = pnand %p1089_p8, %p1049_p13  ;;  %p1098_p7 = por %p1097_p5, %p1096_p3 }
  0x37   : > { %p1092_p0 = pneg %p1091_p12 }
  0x39   : > { %p1099_p10 = pnand %p1098_p7, %p1092_p0 }
  0x3b   : > { %1102 = shalt.err (!%p1099_p10)
}
  0x3c   : > { %s1207_s10 = smov 256   ;;  %s1208_s11 = smov 16  }
  0x3d   : > { %975 = dma.hbm_to_vmem [thread:$0]  (!%p1302_p11), %s1734_s4, 512, %s1306_s30, [#allocation6], %s1207_s10, %s1207_s10, %s1208_s11  }
  0x3e   : > { %s1356_s14 = sadd.s32 1, %s1203_s21   ;;  %s29_s15 = sadd.s32 1, %s1199_s20 }
  0x3f   : > { %s26_s16 = ssub.s32 %s1203_s21, %s1356_s14  ;;  %p36_p13 = scmp.ne.s32.totalorder %s1199_s20, %s1195_s19 }
  0x40   : > { %p27_p9 = scmp.eq.s32.totalorder %s26_s16, 0  ;;  %p37_p2 = scmp.eq.s32.totalorder %s1203_s21, 0 }
  0x41   : > { %p1743_p1 = scmp.eq.s32.totalorder %s1274_s22, 1  ;;  %p986_p6 = scmp.lt.s32.totalorder %s1203_s21, 2 }
  0x42   : > { %s1372_s23 = scalar_select %p27_p9, %s1199_s20, %s29_s15  }
  0x43   : > { %p1366_p4 = por %p1743_p1, %p36_p13  ;;  %p38_p8 = por %p37_p2, %p36_p13 }
  0x44   : > { %s206_s6 = sand.u32 1, %s1199_s20   ;;  %s955_s30 = sshll.u32 %s1203_s21, 7 }
  0x45   : > { %s936_s27 = sshll.u32 %s206_s6, 3  ;;  %s1379_s8 = scalar_lea.hbm %s1730_s0, %s955_s30 }
  0x46   : > { %s210_s9 = scalar_lea.vmem [#allocation2], %s936_s27  ;;  %p1383_p11 = pnand %p986_p6, %p38_p8 }
  0x47   : > { %s218_s28 = sshll.u32 %s210_s9, 4  ;;  %s207_s11 = scalar_lea.sflag [#allocation3], %s206_s6  ;;  %s1381_s28 = int_to_ptr.vmem [resolvable:$true] %s218_s28 }
  0x48   : > { %s1103_s12 = scalar_lea.hbm %s1379_s8, 128  ;;  %p1105_p0 = pneg %p1383_p11 }
  0x49   : > { %p1104_p12 = scmp.ne.s32.totalorder %s1379_s8, %s1103_s12  ;;  %s1108_s16 = scalar_lea.hbm %s1730_s0, 256 }
  0x4a   : > { %p1109_p7 = scmp.lt.u32.totalorder %s1379_s8, %s1730_s0  ;;  %p1110_p10 = scmp.lt.u32.totalorder %s1108_s16, %s1103_s12 }
  0x4b   : > { %p1106_p3 = pnand %p1105_p0, %p1104_p12  ;;  %p1112_p9 = scmp.lt.u32.totalorder %s1103_s12, %s1379_s8 }
  0x4c   : > { %p1111_p13 = por %p1110_p10, %p1109_p7 }
  0x4d   : > { %p1107_p5 = pneg %p1106_p3 }
  0x4e   : > { %p1113_p2 = por %p1112_p9, %p1111_p13 }
  0x50   : > { %p1114_p1 = pnand %p1113_p2, %p1107_p5 }
  0x52   : > { %1117 = shalt.err (!%p1114_p1)
}
  0x53   : > { %s1118_s6 = scalar_lea.vmem %s1381_s28, 128  ;;  %s1209_s29 = smov [#allocation2]  }
  0x54   : > { %p1119_p6 = scmp.ne.s32.totalorder %s1381_s28, %s1118_s6  ;;  %s1123_s7 = sshll.u32 %s1209_s29, 4  ;;  %s1124_s7 = int_to_ptr.vmem [resolvable:$false] %s1123_s7 }
  0x55   : > { %s1125_s9 = scalar_lea.vmem %s1124_s7, 256  ;;  %p1126_p3 = scmp.lt.s32.totalorder %s1381_s28, %s1124_s7 }
  0x56   : > { %p1121_p8 = pnand %p1119_p6, %p1105_p0  ;;  %p1127_p7 = scmp.lt.s32.totalorder %s1125_s9, %s1118_s6 }
  0x58   : > { %p1122_p12 = pneg %p1121_p8  ;;  %p1128_p10 = por %p1127_p7, %p1126_p3 }
  0x5a   : > { %p1129_p13 = pnand %p1128_p10, %p1122_p12 }
  0x5c   : > { %1132 = shalt.err (!%p1129_p13)
}
  0x5d   : > { %979 = dma.hbm_to_vmem [thread:$0]  (!%p1383_p11), %s1379_s8, 128, %s1381_s28, %s207_s11  }
  0x5e   : > { %p1746_p5 = scmp.ne.s32.totalorder %s1741_s26, 0 }
  0x5f   : > { %s1415_s12 = sand.u32 (!%p1746_p5), 1, %s1195_s19   ;;  %p1747_p0 = scmp.ne.s32.totalorder (!%p1746_p5), %s1739_s24, 0 }
  0x60   : > { %227 = sbr.rel (%p1746_p5) target bundleno = 2042 (0x7fa), region = 40  ;;  %s940_s13 = sshll.u32 (!%p1746_p5), %s1415_s12, 3 }
  0x61   : > { %s230_s15 = scalar_lea.sflag (!%p1746_p5), [#allocation3], %s1415_s12  ;;  %s233_s16 = scalar_lea.vmem (!%p1746_p5), [#allocation2], %s940_s13 }
  0x67   : > { %1178 = dma.done.wait (%p1747_p0), %s230_s15, 128  }
  0x68   : > { %1180 = vsyncadd (%p1747_p0), %s230_s15, 4294967168  ;;  %p1748_p11 = scmp.eq.s32.totalorder %s1274_s22, 0 }
  0x6a   : > { %1182 = dma.done.wait (%p1748_p11), [#allocation6], 544   ;;  %p1749_p9 = pmov %p1748_p11 }
  0x6b   : > { %v1429_v0 = vld [vmem:[%s233_s16] sm:$0xff]  ;;  %s1210_s26 = smov 1   ;;  %s1211_s8 = smov 16   ;;  %v1216_v2 = vmov 0   ;;  %v274_v3 = vlaneseq  ;;  %v1470_v8 = vld [vmem:[#allocation7] sm:$0xff]  ;;  %vm358_vm0 = vcmask 130048  }
  0x6c   : > { %1184 = vsyncadd (%p1749_p9), [#allocation6], 4294966752  ;;  %380 = vrot.lane.b32.xlu1 %v1429_v0, %s1210_s26  ;;  %356 = vrot.lane.b32.xlu0 %v1429_v0, %s1211_s8  ;;  %v1437_v1 = vcombine.high %v1429_v0, %v1429_v0  ;;  %s1212_s24 = smov 17   ;;  %s1213_s28 = smov 15   ;;  %v1472_v9 = vld [vmem:[#allocation7 + $0x8] sm:$0xff]  ;;  %vm382_vm1 = vcmask 7168  }
  0x6d   : > { %s1214_s10 = smov 127   ;;  %s1215_s11 = smov 112   ;;  %520 = vmatprep.mubr.bf16.mxu0 %v1216_v2  ;;  %1038 = vset.pattern.permute.xlu1 %v1216_v2  ;;  %v1467_v4 = vshrl.u32 %v274_v3, 7  ;;  %vm346_vm2 = vcmask 138240   ;;  %vm370_vm3 = vcmask 121856   ;;  %vm462_vm4 = vcmask 1043456  }
  0x6e   : > { %s1217_s27 = smov 113   ;;  %756 = vmatprep.mubr.bf16.mxu1 %v1216_v2  ;;  %s1218_s30 = smov 111   ;;  %vm393_vm5 = vcmask 1039360   ;;  %vm417_vm6 = vcmask 916480   ;;  %vm405_vm7 = vcmask 924672   ;;  %vm429_vm8 = vcmask 908288  }
  0x6f   : > { %v284_v7 = vsub.s32 1, %v1467_v4  ;;  %v300_v10 = vsub.s32 3, %v1467_v4  ;;  %v276_v15 = vsub.s32 0, %v1467_v4  ;;  %v292_v20 = vsub.s32 2, %v1467_v4  ;;  %s956_s15 = sshll.u32 %s1274_s22, 7  ;;  %s267_s16 = scalar_lea.vmem [#allocation8], %s940_s13 }
  0x70   : > { %344 = vrot.lane.b32.xlu1 %v1429_v0, %s1212_s24  ;;  %353 = vrot.lane.b32.xlu0 %v1437_v1, %s1211_s8  ;;  %v308_v35 = vsub.s32 5, %v1467_v4  ;;  %v324_v40 = vsub.s32 7, %v1467_v4  ;;  %v316_v51 = vsub.s32 6, %v1467_v4  ;;  %vm481_vm9 = vcmask 1041408   ;;  %s1222_s22 = smov [#allocation8]  }
  0x71   : > { %v1476_v12 = vrot.slane %v1470_v8, %v284_v7  ;;  %v1479_v13 = vrot.slane %v1472_v9, %v284_v7  ;;  %v1485_v18 = vrot.slane %v1470_v8, %v300_v10  ;;  %v1488_v19 = vrot.slane %v1472_v9, %v300_v10  ;;  %s1137_s13 = sshll.u32 %s1222_s22, 4  ;;  %s1138_s13 = int_to_ptr.vmem [resolvable:$false] %s1137_s13 }
  0x72   : > { %v1494_v24 = vrot.slane %v1470_v8, %v276_v15  ;;  %v1497_v25 = vrot.slane %v1472_v9, %v276_v15  ;;  %v1506_v33 = vrot.slane %v1470_v8, %v292_v20  ;;  %v1509_v34 = vrot.slane %v1472_v9, %v292_v20 }
  0x73   : > { %v1520_v49 = vrot.slane %v1470_v8, %v308_v35  ;;  %v1523_v50 = vrot.slane %v1472_v9, %v308_v35  ;;  %v1533_v62 = vrot.slane %v1470_v8, %v324_v40  ;;  %v1536_v63 = vrot.slane %v1472_v9, %v324_v40 }
  0x74   : > { %377 = vrot.lane.b32.xlu1 %v1437_v1, %s1210_s26  ;;  %341 = vrot.lane.b32.xlu0 %v1437_v1, %s1212_s24  ;;  %v1543_v10 = vrot.slane %v1470_v8, %v316_v51  ;;  %v1548_v15 = vrot.slane %v1472_v9, %v316_v51  ;;  %v1556_v9 = vld [vmem:[#allocation7 + $0x18] ss:$0 sm:$0xff]  ;;  %vm477_vm10 = vcmask 293888  }
  0x78   : > { %368 = vrot.lane.b32.xlu1 %v1429_v0, %s1213_s28  ;;  %365 = vrot.lane.b32.xlu0 %v1437_v1, %s1213_s28 }
  0x7c   : > { %391 = vrot.lane.b32.xlu1 %v1437_v1, %s1214_s10  ;;  %389 = vrot.lane.b32.xlu0 %v1429_v0, %s1214_s10 }
  0x80   : > { %415 = vrot.lane.b32.xlu1 %v1437_v1, %s1215_s11  ;;  %413 = vrot.lane.b32.xlu0 %v1429_v0, %s1215_s11 }
  0x84   : > { %403 = vrot.lane.b32.xlu1 %v1437_v1, %s1217_s27  ;;  %401 = vrot.lane.b32.xlu0 %v1429_v0, %s1217_s27 }
  0x88   : > { %427 = vrot.lane.b32.xlu1 %v1437_v1, %s1218_s30  ;;  %425 = vrot.lane.b32.xlu0 %v1429_v0, %s1218_s30 }
  0xde   : > { %v381_v5 = vpop.permute.xlu1 %380  ;;  %v357_v6 = vpop.permute.xlu0 %356 }
  0xe2   : > { %v345_v11 = vpop.permute.xlu1 %344  ;;  %v354_v14 = vpop.permute.xlu0 %353 }
  0xe3   : > { %v359_v16 = vsel %vm358_vm0, %v357_v6, %v354_v14  ;;  %v362_v17 = vsel %vm358_vm0, %v354_v14, %v357_v6 }
  0xe4   : > { %v363_v21 = vmul.f32 %v362_v17, %v1476_v12  ;;  %v364_v22 = vmul.f32 %v359_v16, %v1479_v13 }
  0xe6   : > { %v378_v23 = vpop.permute.xlu1 %377  ;;  %v342_v26 = vpop.permute.xlu0 %341  ;;  %v439_v41 = vrot.slane %v363_v21, 4  ;;  %v440_v42 = vrot.slane %v364_v22, 4 }
  0xe7   : > { %v383_v27 = vsel %vm382_vm1, %v381_v5, %v378_v23  ;;  %v386_v28 = vsel %vm382_vm1, %v378_v23, %v381_v5  ;;  %v347_v29 = vsel %vm346_vm2, %v345_v11, %v342_v26  ;;  %v350_v30 = vsel %vm346_vm2, %v342_v26, %v345_v11 }
  0xe8   : > { %v387_v31 = vmul.f32 %v386_v28, %v1485_v18  ;;  %v388_v32 = vmul.f32 %v383_v27, %v1488_v19  ;;  %v351_v36 = vmul.f32 %v350_v30, %v1494_v24  ;;  %v352_v37 = vmul.f32 %v347_v29, %v1497_v25  ;;  %v1554_v29 = vld [vmem:[#allocation7 + $0x10] ss:$0 sm:$0xff] }
  0xea   : > { %v369_v38 = vpop.permute.xlu1 %368  ;;  %v366_v39 = vpop.permute.xlu0 %365  ;;  %v445_v45 = vrot.slane %v387_v31, 4  ;;  %v446_v46 = vrot.slane %v388_v32, 4  ;;  %v464_v54 = vsel %vm462_vm4, %v352_v37, %v440_v42  ;;  %v463_v56 = vsel %vm462_vm4, %v351_v36, %v439_v41 }
  0xeb   : > { %v371_v43 = vsel %vm370_vm3, %v369_v38, %v366_v39  ;;  %v374_v44 = vsel %vm370_vm3, %v366_v39, %v369_v38 }
  0xec   : > { %v375_v47 = vmul.f32 %v374_v44, %v1506_v33  ;;  %v376_v48 = vmul.f32 %v371_v43, %v1509_v34 }
  0xee   : > { %v392_v52 = vpop.permute.xlu1 %391  ;;  %v390_v53 = vpop.permute.xlu0 %389  ;;  %v466_v55 = vsel %vm462_vm4, %v376_v48, %v446_v46  ;;  %v465_v57 = vsel %vm462_vm4, %v375_v47, %v445_v45  ;;  %v338_v47 = vld [vmem:[%s1731_s1] sm:$0x3] }
  0xef   : > { %v394_v58 = vsel %vm393_vm5, %v390_v53, %v392_v52  ;;  %v398_v59 = vsel %vm393_vm5, %v392_v52, %v390_v53  ;;  %v472_v60 = vpack.c.bf16 %v466_v55, %v464_v54  ;;  %v471_v61 = vpack.c.bf16 %v465_v57, %v463_v56 }
  0xf0   : > { %v399_v2 = vmul.f32 %v394_v58, %v1520_v49  ;;  %v400_v3 = vmul.f32 %v398_v59, %v1523_v50 }
  0xf1   : > { %488 = vmatprep.subr.bf16.mxu0 %v472_v60 }
  0xf2   : > { %v416_v4 = vpop.permute.xlu1 %415  ;;  %489 = vmatpush1.bf16.msra.mxu0 %v471_v61  ;;  %v414_v5 = vpop.permute.xlu0 %413  ;;  %v452_v16 = vrot.slane %v399_v2, 4  ;;  %v453_v17 = vrot.slane %v400_v3, 4 }
  0xf3   : > { %v418_v6 = vsel %vm417_vm6, %v414_v5, %v416_v4  ;;  %v422_v7 = vsel %vm417_vm6, %v416_v4, %v414_v5 }
  0xf4   : > { %v423_v11 = vmul.f32 %v418_v6, %v1533_v62  ;;  %v424_v14 = vmul.f32 %v422_v7, %v1536_v63  ;;  %v468_v32 = vsel %vm462_vm4, %v1437_v1, %v453_v17  ;;  %v467_v36 = vsel %vm462_vm4, %v1429_v0, %v452_v16 }
  0xf6   : > { %v404_v20 = vpop.permute.xlu1 %403  ;;  %v402_v21 = vpop.permute.xlu0 %401  ;;  %v458_v26 = vrot.slane %v423_v11, 4  ;;  %v459_v8 = vrot.slane %v424_v14, 4 }
  0xf7   : > { %v406_v22 = vsel %vm405_vm7, %v402_v21, %v404_v20  ;;  %v410_v23 = vsel %vm405_vm7, %v404_v20, %v402_v21 }
  0xf8   : > { %v411_v27 = vmul.f32 %v406_v22, %v1543_v10  ;;  %v412_v28 = vmul.f32 %v410_v23, %v1548_v15 }
  0xfa   : > { %v428_v30 = vpop.permute.xlu1 %427  ;;  %v426_v31 = vpop.permute.xlu0 %425  ;;  %v470_v35 = vsel %vm462_vm4, %v412_v28, %v459_v8  ;;  %v469_v37 = vsel %vm462_vm4, %v411_v27, %v458_v26 }
  0xfb   : > { %v430_v38 = vsel %vm429_vm8, %v426_v31, %v428_v30  ;;  %v434_v39 = vsel %vm429_vm8, %v428_v30, %v426_v31  ;;  %v474_v40 = vpack.c.bf16 %v470_v35, %v468_v32  ;;  %v473_v41 = vpack.c.bf16 %v469_v37, %v467_v36  ;;  %v1583_v36 = vld [vmem:[%s1733_s3] sm:$0xf] }
  0xfc   : > { %v435_v42 = vmul.f32 %v1554_v29, %v430_v38  ;;  %v436_v43 = vmul.f32 %v1556_v9, %v434_v39  ;;  %v1219_v35 = vmov 1  }
  0xfd   : > { %490 = vmatprep.subr.bf16.mxu0 %v474_v40  ;;  %1039 = vset.pattern.permute.xlu0 %v1219_v35 }
  0xfe   : > { %v475_v44 = vpack.c.bf16 %v435_v42, %v435_v42  ;;  %v476_v45 = vpack.c.bf16 %v436_v43, %v436_v43  ;;  %491 = vmatpush1.bf16.msra.mxu0 %v473_v41 }
 0x100   : > { %946 = vmatprep.subr.msk.bf16.mxu0 %vm481_vm9, %v476_v45  ;;  %v483_v46 = vsel %vm481_vm9, %v475_v44, 0 }
 0x102   : > { %493 = vmatpush1.bf16.msra.mxu0 %v483_v46 }
 0x105   : > { %947 = vmatmul.mubr.msk.bf16.vlgmr.msra.gmra.mrb[0].mxu0 %vm477_vm10, %v338_v47 }
 0x1d8   : > { %v522_v48 = vpop.f32.mrb[0].mxu0 }
 0x1d9   : > { %v524_v51 = vpop.f32.mrb[1].mxu0  ;;  %v529_v52 = vsel %vm462_vm4, %v522_v48, 0.0 }
 0x1da   : > { %v526_v53 = vpop.f32.mrb[2].mxu0  ;;  %v530_v54 = vsel %vm462_vm4, %v524_v51, 0.0 }
 0x1db   : > { %v527_v55 = vpop.f32.mrb[3].mxu0  ;;  %v531_v56 = vadd.f32 %v530_v54, %v529_v52 }
 0x1dd   : > { %532 = vadd.xlane.f32.xlu0 %v531_v56 }
 0x26a   : > { %v533_v57 = vpop.xlane.xlu0 %532 }
 0x26b   : > { %v534_v58 = vsel %vm462_vm4, %v533_v57, 0.0 }
 0x26c   : > { %v535_v59 = vrot.slane %v534_v58, 4 }
 0x26e   : > { %v536_v60 = vadd.f32 %v535_v59, %v534_v58 }
 0x270   : > { %v537_v61 = vrot.slane %v536_v60, 2 }
 0x272   : > { %v538_v2 = vadd.f32 %v537_v61, %v536_v60 }
 0x274   : > { %v539_v3 = vrot.slane %v538_v2, 1 }
 0x276   : > { %v540_v4 = vadd.f32 %v539_v3, %v538_v2 }
 0x278   : > { %v542_v5 = vmul.f32 0.0009765625, %v540_v4 }
 0x27a   : > { %v543_v6 = vsub.f32 %v522_v48, %v542_v5  ;;  %v544_v7 = vsub.f32 %v524_v51, %v542_v5 }
 0x27c   : > { %v545_v11 = vmul.f32 %v543_v6, %v543_v6  ;;  %v546_v14 = vmul.f32 %v544_v7, %v544_v7 }
 0x27e   : > { %v547_v16 = vsel %vm462_vm4, %v545_v11, 0.0  ;;  %v548_v17 = vsel %vm462_vm4, %v546_v14, 0.0 }
 0x27f   : > { %v549_v20 = vadd.f32 %v548_v17, %v547_v16 }
 0x281   : > { %550 = vadd.xlane.f32.xlu1 %v549_v20 }
 0x30e   : > { %v551_v21 = vpop.xlane.xlu1 %550 }
 0x30f   : > { %v552_v22 = vsel %vm462_vm4, %v551_v21, 0.0 }
 0x310   : > { %v553_v23 = vrot.slane %v552_v22, 4 }
 0x312   : > { %v554_v26 = vadd.f32 %v553_v23, %v552_v22 }
 0x314   : > { %v555_v8 = vrot.slane %v554_v26, 2 }
 0x316   : > { %v556_v27 = vadd.f32 %v555_v8, %v554_v26 }
 0x318   : > { %v557_v28 = vrot.slane %v556_v27, 1 }
 0x31a   : > { %v558_v30 = vadd.f32 %v557_v28, %v556_v27 }
 0x31c   : > { %v559_v31 = vmul.f32 0.0009765625, %v558_v30 }
 0x31e   : > { %v560_v32 = vadd.f32 1e-05, %v559_v31 }
 0x320   : > { %1043 = vrsqrt.f32 %v560_v32 }
 0x32a   : > { %v1044_v37 = vpop.eup %1043 }
 0x32b   : > { %v563_v38 = vmul.f32 %v1044_v37, %v1583_v36 }
 0x32d   : > { %572 = vperm.xlu1 %1038, %v563_v38   ;;  %v564_v39 = vmul.f32 %v563_v38, %v542_v5 }
 0x32f   : > { %566 = vrot.lane.b32.xlu0 %v564_v39, %s1210_s26 }
 0x3a1   : > { %v567_v40 = vpop.permute.xlu0 %566 }
 0x3a2   : > { %v569_v41 = vsub.f32 %v1583_v36, %v567_v40 }
 0x3a4   : > { %579 = vperm.xlu0 %1039, %v569_v41  }
 0x3ac   : > { %v573_v42 = vpop.permute.xlu1 %572 }
 0x3ad   : > { %v576_v43 = vmul.f32 %v573_v42, %v524_v51  ;;  %v575_v45 = vmul.f32 %v573_v42, %v522_v48 }
 0x423   : > { %v580_v44 = vpop.permute.xlu0 %579 }
 0x424   : > { %v583_v46 = vadd.f32 %v580_v44, %v576_v43  ;;  %v582_v47 = vadd.f32 %v580_v44, %v575_v45 }
 0x426   : > { %v1588_v52 = vmax.f32 %v583_v46, 0.0  ;;  %v1594_v53 = vmax.f32 %v582_v47, 0.0 }
 0x428   : > { %622 = vrot.lane.b32.xlu0 %v1588_v52, %s1210_s26  ;;  %600 = vrot.lane.b32.xlu1 %v1588_v52, %s1211_s8 }
 0x42c   : > { %588 = vrot.lane.b32.xlu0 %v1588_v52, %s1212_s24  ;;  %603 = vrot.lane.b32.xlu1 %v1594_v53, %s1211_s8 }
 0x430   : > { %611 = vrot.lane.b32.xlu0 %v1588_v52, %s1213_s28  ;;  %625 = vrot.lane.b32.xlu1 %v1594_v53, %s1210_s26 }
 0x434   : > { %633 = vrot.lane.b32.xlu0 %v1594_v53, %s1214_s10  ;;  %592 = vrot.lane.b32.xlu1 %v1594_v53, %s1212_s24 }
 0x438   : > { %655 = vrot.lane.b32.xlu0 %v1594_v53, %s1215_s11  ;;  %614 = vrot.lane.b32.xlu1 %v1594_v53, %s1213_s28  ;;  %s1686_s28 = scalar_lea.hbm %s1735_s5, %s956_s15 }
 0x43c   : > { %644 = vrot.lane.b32.xlu0 %v1594_v53, %s1217_s27  ;;  %635 = vrot.lane.b32.xlu1 %v1588_v52, %s1214_s10  ;;  %s828_s10 = scalar_lea.sflag [#allocation4], %s1415_s12 }
 0x440   : > { %666 = vrot.lane.b32.xlu0 %v1594_v53, %s1218_s30  ;;  %657 = vrot.lane.b32.xlu1 %v1588_v52, %s1215_s11 }
 0x444   : > { %646 = vrot.lane.b32.xlu1 %v1588_v52, %s1217_s27  ;;  %s1139_s27 = scalar_lea.vmem %s1138_s13, 256 }
 0x448   : > { %668 = vrot.lane.b32.xlu1 %v1588_v52, %s1218_s30 }
 0x49a   : > { %v623_v48 = vpop.permute.xlu0 %622  ;;  %v601_v51 = vpop.permute.xlu1 %600 }
 0x49e   : > { %v589_v54 = vpop.permute.xlu0 %588  ;;  %v604_v55 = vpop.permute.xlu1 %603 }
 0x49f   : > { %v605_v58 = vsel %vm358_vm0, %v604_v55, %v601_v51  ;;  %v608_v59 = vsel %vm358_vm0, %v601_v51, %v604_v55 }
 0x4a0   : > { %v609_v3 = vmul.f32 %v608_v59, %v1476_v12  ;;  %v610_v4 = vmul.f32 %v605_v58, %v1479_v13 }
 0x4a2   : > { %v612_v56 = vpop.permute.xlu0 %611  ;;  %v626_v57 = vpop.permute.xlu1 %625  ;;  %v679_v21 = vrot.slane %v609_v3, 4  ;;  %v680_v22 = vrot.slane %v610_v4, 4  ;;  %v586_v4 = vld [vmem:[#allocation5] sm:$0x3] }
 0x4a3   : > { %v627_v60 = vsel %vm382_vm1, %v626_v57, %v623_v48  ;;  %v630_v61 = vsel %vm382_vm1, %v623_v48, %v626_v57 }
 0x4a4   : > { %v631_v7 = vmul.f32 %v630_v61, %v1485_v18  ;;  %v632_v11 = vmul.f32 %v627_v60, %v1488_v19 }
 0x4a6   : > { %v593_v2 = vpop.permute.xlu1 %592  ;;  %v634_v14 = vpop.permute.xlu0 %633  ;;  %v685_v23 = vrot.slane %v631_v7, 4  ;;  %v686_v26 = vrot.slane %v632_v11, 4 }
 0x4a7   : > { %v594_v5 = vsel %vm346_vm2, %v593_v2, %v589_v54  ;;  %v597_v6 = vsel %vm346_vm2, %v589_v54, %v593_v2 }
 0x4a8   : > { %v598_v16 = vmul.f32 %v597_v6, %v1494_v24  ;;  %v599_v17 = vmul.f32 %v594_v5, %v1497_v25 }
 0x4aa   : > { %v615_v20 = vpop.permute.xlu1 %614  ;;  %v656_v27 = vpop.permute.xlu0 %655  ;;  %v702_v28 = vsel %vm462_vm4, %v599_v17, %v680_v22  ;;  %v701_v25 = vsel %vm462_vm4, %v598_v16, %v679_v21 }
 0x4ab   : > { %v616_v12 = vsel %vm370_vm3, %v615_v20, %v612_v56  ;;  %v619_v13 = vsel %vm370_vm3, %v612_v56, %v615_v20 }
 0x4ac   : > { %v620_v8 = vmul.f32 %v619_v13, %v1506_v33  ;;  %v621_v18 = vmul.f32 %v616_v12, %v1509_v34 }
 0x4ae   : > { %v636_v19 = vpop.permute.xlu1 %635  ;;  %v704_v24 = vsel %vm462_vm4, %v621_v18, %v686_v26  ;;  %v703_v30 = vsel %vm462_vm4, %v620_v8, %v685_v23  ;;  %v645_v41 = vpop.permute.xlu0 %644 }
 0x4af   : > { %v637_v31 = vsel %vm393_vm5, %v634_v14, %v636_v19  ;;  %v641_v32 = vsel %vm393_vm5, %v636_v19, %v634_v14  ;;  %v710_v35 = vpack.c.bf16 %v704_v24, %v702_v28  ;;  %v709_v37 = vpack.c.bf16 %v703_v30, %v701_v25 }
 0x4b0   : > { %v642_v33 = vmul.f32 %v637_v31, %v1520_v49  ;;  %v643_v34 = vmul.f32 %v641_v32, %v1523_v50  ;;  %v1220_v30 = vmov 2  }
 0x4b1   : > { %724 = vmatprep.subr.bf16.mxu1 %v710_v35  ;;  %1040 = vset.pattern.permute.xlu1 %v1220_v30 }
 0x4b2   : > { %725 = vmatpush1.bf16.msra.mxu1 %v709_v37  ;;  %v658_v38 = vpop.permute.xlu1 %657  ;;  %v691_v44 = vrot.slane %v642_v33, 4  ;;  %v692_v45 = vrot.slane %v643_v34, 4  ;;  %v667_v55 = vpop.permute.xlu0 %666 }
 0x4b3   : > { %v659_v39 = vsel %vm417_vm6, %v656_v27, %v658_v38  ;;  %v663_v40 = vsel %vm417_vm6, %v658_v38, %v656_v27 }
 0x4b4   : > { %v664_v42 = vmul.f32 %v659_v39, %v1533_v62  ;;  %v665_v43 = vmul.f32 %v663_v40, %v1536_v63  ;;  %v706_v62 = vsel %vm462_vm4, %v1588_v52, %v692_v45  ;;  %v705_v57 = vsel %vm462_vm4, %v1594_v53, %v691_v44 }
 0x4b6   : > { %v647_v46 = vpop.permute.xlu1 %646  ;;  %v697_v48 = vrot.slane %v664_v42, 4  ;;  %v698_v50 = vrot.slane %v665_v43, 4  ;;  %v1221_v42 = vmov 3  }
 0x4b7   : > { %v648_v47 = vsel %vm405_vm7, %v645_v41, %v647_v46  ;;  %v652_v49 = vsel %vm405_vm7, %v647_v46, %v645_v41  ;;  %1041 = vset.pattern.permute.xlu0 %v1221_v42 }
 0x4b8   : > { %v653_v51 = vmul.f32 %v648_v47, %v1543_v10  ;;  %v654_v54 = vmul.f32 %v652_v49, %v1548_v15 }
 0x4ba   : > { %v669_v56 = vpop.permute.xlu1 %668  ;;  %v708_v63 = vsel %vm462_vm4, %v654_v54, %v698_v50  ;;  %v707_v58 = vsel %vm462_vm4, %v653_v51, %v697_v48 }
 0x4bb   : > { %v670_v59 = vsel %vm429_vm8, %v667_v55, %v669_v56  ;;  %v674_v60 = vsel %vm429_vm8, %v669_v56, %v667_v55  ;;  %v712_v61 = vpack.c.bf16 %v708_v63, %v706_v62  ;;  %v711_v10 = vpack.c.bf16 %v707_v58, %v705_v57 }
 0x4bc   : > { %v675_v15 = vmul.f32 %v1554_v29, %v670_v59  ;;  %v676_v2 = vmul.f32 %v1556_v9, %v674_v60 }
 0x4bd   : > { %726 = vmatprep.subr.bf16.mxu1 %v712_v61 }
 0x4be   : > { %v713_v3 = vpack.c.bf16 %v675_v15, %v675_v15  ;;  %v714_v52 = vpack.c.bf16 %v676_v2, %v676_v2  ;;  %727 = vmatpush1.bf16.msra.mxu1 %v711_v10 }
 0x4c0   : > { %948 = vmatprep.subr.msk.bf16.mxu1 %vm481_vm9, %v714_v52  ;;  %v719_v53 = vsel %vm481_vm9, %v713_v3, 0 }
 0x4c2   : > { %729 = vmatpush1.bf16.msra.mxu1 %v719_v53 }
 0x4c5   : > { %949 = vmatmul.mubr.msk.bf16.vlgmr.msra.gmra.mrb[0].mxu1 %vm477_vm10, %v586_v4 }
 0x598   : > { %v758_v5 = vpop.f32.mrb[0].mxu1 }
 0x599   : > { %v760_v6 = vpop.f32.mrb[1].mxu1  ;;  %v765_v7 = vsel %vm462_vm4, %v758_v5, 0.0 }
 0x59a   : > { %v762_v11 = vpop.f32.mrb[2].mxu1  ;;  %v766_v29 = vsel %vm462_vm4, %v760_v6, 0.0 }
 0x59b   : > { %v763_v9 = vpop.f32.mrb[3].mxu1  ;;  %v767_v14 = vadd.f32 %v766_v29, %v765_v7 }
 0x59d   : > { %768 = vadd.xlane.f32.xlu0 %v767_v14 }
 0x62a   : > { %v769_v16 = vpop.xlane.xlu0 %768 }
 0x62b   : > { %v770_v17 = vsel %vm462_vm4, %v769_v16, 0.0 }
 0x62c   : > { %v771_v20 = vrot.slane %v770_v17, 4 }
 0x62e   : > { %v772_v21 = vadd.f32 %v771_v20, %v770_v17 }
 0x630   : > { %v773_v22 = vrot.slane %v772_v21, 2 }
 0x632   : > { %v774_v12 = vadd.f32 %v773_v22, %v772_v21 }
 0x634   : > { %v775_v13 = vrot.slane %v774_v12, 1 }
 0x636   : > { %v776_v23 = vadd.f32 %v775_v13, %v774_v12 }
 0x638   : > { %v777_v26 = vmul.f32 0.0009765625, %v776_v23 }
 0x63a   : > { %v778_v8 = vsub.f32 %v758_v5, %v777_v26  ;;  %v779_v18 = vsub.f32 %v760_v6, %v777_v26 }
 0x63c   : > { %v780_v27 = vmul.f32 %v778_v8, %v778_v8  ;;  %v781_v19 = vmul.f32 %v779_v18, %v779_v18 }
 0x63e   : > { %v782_v28 = vsel %vm462_vm4, %v780_v27, 0.0  ;;  %v783_v24 = vsel %vm462_vm4, %v781_v19, 0.0 }
 0x63f   : > { %v784_v25 = vadd.f32 %v783_v24, %v782_v28 }
 0x641   : > { %785 = vadd.xlane.f32.xlu1 %v784_v25 }
 0x6ce   : > { %v786_v31 = vpop.xlane.xlu1 %785 }
 0x6cf   : > { %v787_v32 = vsel %vm462_vm4, %v786_v31, 0.0 }
 0x6d0   : > { %v788_v35 = vrot.slane %v787_v32, 4 }
 0x6d2   : > { %v789_v37 = vadd.f32 %v788_v35, %v787_v32 }
 0x6d4   : > { %v790_v33 = vrot.slane %v789_v37, 2 }
 0x6d6   : > { %v791_v34 = vadd.f32 %v790_v33, %v789_v37 }
 0x6d8   : > { %v792_v38 = vrot.slane %v791_v34, 1 }
 0x6da   : > { %v793_v39 = vadd.f32 %v792_v38, %v791_v34 }
 0x6dc   : > { %v794_v40 = vmul.f32 0.0009765625, %v793_v39 }
 0x6de   : > { %v795_v41 = vadd.f32 1e-05, %v794_v40 }
 0x6e0   : > { %1045 = vrsqrt.f32 %v795_v41 }
 0x6ea   : > { %v1046_v43 = vpop.eup %1045 }
 0x6eb   : > { %v797_v44 = vmul.f32 %v1046_v43, %v1583_v36 }
 0x6ed   : > { %806 = vperm.xlu1 %1040, %v797_v44   ;;  %v798_v45 = vmul.f32 %v797_v44, %v777_v26 }
 0x6ef   : > { %800 = vrot.lane.b32.xlu0 %v798_v45, %s1210_s26  ;;  %s842_s26 = sshll.u32 %s267_s16, 4  ;;  %s1688_s26 = int_to_ptr.vmem [resolvable:$true] %s842_s26 }
 0x6f0   : > { %s1133_s11 = scalar_lea.vmem %s1688_s26, 128  ;;  %p1140_p8 = scmp.lt.s32.totalorder %s1688_s26, %s1138_s13 }
 0x6f1   : > { %p1134_p2 = scmp.ne.s32.totalorder %s1688_s26, %s1133_s11  ;;  %p1141_p12 = scmp.lt.s32.totalorder %s1139_s27, %s1133_s11 }
 0x6f3   : > { %p1135_p1 = pnand %p1134_p2, %p1366_p4  ;;  %p1142_p3 = por %p1141_p12, %p1140_p8 }
 0x6f5   : > { %p1136_p6 = pneg %p1135_p1 }
 0x6f7   : > { %p1143_p7 = pnand %p1142_p3, %p1136_p6 }
 0x761   : > { %v801_v46 = vpop.permute.xlu0 %800 }
 0x762   : > { %v803_v47 = vsub.f32 %v1583_v36, %v801_v46 }
 0x764   : > { %813 = vperm.xlu0 %1041, %v803_v47  }
 0x76c   : > { %v807_v49 = vpop.permute.xlu1 %806 }
 0x76d   : > { %v809_v48 = vmul.f32 %v807_v49, %v758_v5  ;;  %v810_v50 = vmul.f32 %v807_v49, %v760_v6 }
 0x7e3   : > { %v814_v51 = vpop.permute.xlu0 %813 }
 0x7e4   : > { %v816_v54 = vadd.f32 %v814_v51, %v809_v48  ;;  %v817_v55 = vadd.f32 %v814_v51, %v810_v50 }
 0x7e6   : > { %v818_v56 = vadd.f32 %v816_v54, %v1429_v0  ;;  %v819_v62 = vadd.f32 %v817_v55, %v1437_v1 }
 0x7e8   : > { %v820_v63 = vmax.f32 %v818_v56, 0.0  ;;  %v821_v57 = vmax.f32 %v819_v62, 0.0 }
 0x7ea   : > { %v824_v36 = vcombine.low %v820_v63, %v821_v57 }
 0x7ec   : > { %826 = vst [vmem:[%s267_s16] sm:$0xff] %v824_v36 }
 0x7ed   : > { %1146 = shalt.err (!%p1143_p7)
}
 0x7ee   : > { %s1147_s12 = scalar_lea.hbm %s1686_s28, 128  ;;  %s1151_s29 = scalar_lea.hbm %s1735_s5, 256 }
 0x7ef   : > { %p1148_p10 = scmp.ne.s32.totalorder %s1686_s28, %s1147_s12  ;;  %p1152_p0 = scmp.lt.u32.totalorder %s1686_s28, %s1735_s5 }
 0x7f0   : > { %p1153_p11 = scmp.lt.u32.totalorder %s1151_s29, %s1147_s12  ;;  %p1155_p2 = scmp.lt.u32.totalorder %s1147_s12, %s1686_s28 }
 0x7f1   : > { %p1149_p13 = pnand %p1148_p10, %p1366_p4 }
 0x7f2   : > { %p1154_p9 = por %p1153_p11, %p1152_p0 }
 0x7f3   : > { %p1150_p5 = pneg %p1149_p13 }
 0x7f4   : > { %p1156_p1 = por %p1155_p2, %p1154_p9 }
 0x7f6   : > { %p1157_p6 = pnand %p1156_p1, %p1150_p5 }
 0x7f8   : > { %1160 = shalt.err (!%p1157_p6)
}
 0x7f9   : > { %967 = dma.vmem_to_hbm [thread:$0]  (%p1366_p4), %s1688_s26, 128, %s1686_s28, %s828_s10  }
 0x7fa PF: > { %s854_s15 = sand.u32 1, %s1191_s18   ;;  %p1750_p8 = scmp.ne.s32.totalorder %s1740_s25, 0 }
 0x7fb   : > { %p1751_p12 = scmp.ge.s32.totalorder %s1203_s21, 2  ;;  %s855_s16 = scalar_lea.sflag [#allocation4], %s854_s15 }
 0x7fd   : > { %p981_p3 = pnand %p1751_p12, %p1750_p8 }
 0x7ff   : > { %1186 = dma.done.wait (!%p981_p3), %s855_s16, 128  }
 0x800   : > { %1188 = vsyncadd (!%p981_p3), %s855_s16, 4294967168  ;;  %p19_p7 = scmp.ge.s32.totalorder %s1356_s14, 4   ;;  %s1752_s18 = smov %s1195_s19 }
 0x801   : > { %s1753_s19 = smov %s1199_s20  ;;  %s1754_s20 = smov %s1372_s23 }
 0x802   : > { %s1755_s21 = smov %s1356_s14  ;;  %21 = sbr.rel (!%p19_p7) target bundleno = 6 (0x6), region = 93 }
 0x809   :  { %860 = vsyncpa [#allocation3], 1 }
 0x80a   :  { %862 = vsyncpa [#allocation3 + $0x1], 1 }
 0x80b   :  { %863 = vsyncpa [#allocation6], 1 }
 0x80c   :  { %864 = vsyncpa [#allocation4], 1 }
 0x80d   :  { %866 = vsyncpa [#allocation4 + $0x1], 1 }

</bundles_post_ra>
